<compile_context>
chip_gen: v7x
topology: tpu7x:2x2x1
jax: 0.10.0
libtpu: 0.0.40
codegen_flags: <defaults>
</compile_context>

<pallas_src>
import functools

import jax
import jax.numpy as jnp
from jax.experimental import pallas as pl
from jax.experimental.pallas import tpu as pltpu


# Packed-parameter layout (rows x 128 lanes, f32), all stored transposed
# (out_features on sublanes) for the feature-on-sublane compute:
#   rows  0:16 , lanes 0:5   -> W1^T (16, 5)    rows  0:16 , lane  5 -> b1 (16,)
#   rows 16:24 , lanes 0:16  -> W2^T ( 8, 16)   rows 16:24 , lane 16 -> b2 ( 8,)
#   rows 24:24+C, lanes 0:8  -> W3^T ( C,  8)   rows 24:24+C, lane 8 -> b3 ( C,)
_W1_ROWS = slice(0, 16)
_W2_ROWS = slice(16, 24)
_W3_ROW0 = 24


def _mlp_kernel(xt_ref, p_ref, ot_ref, *, num_classes):
    """One batch tile: xt_ref (5, TB), p_ref (R, 128), ot_ref (C, TB)."""
    xt = xt_ref[...]                                   # (5, TB) f32, batch on lanes
    p = p_ref[...]                                     # packed params (R, 128)

    w1t = p[_W1_ROWS, 0:5]                             # (16, 5)
    b1t = p[_W1_ROWS, 5:6]                             # (16, 1)
    w2t = p[_W2_ROWS, 0:16]                            # (8, 16)
    b2t = p[_W2_ROWS, 16:17]                           # (8, 1)
    w3t = p[_W3_ROW0:_W3_ROW0 + num_classes, 0:8]      # (C, 8)
    b3t = p[_W3_ROW0:_W3_ROW0 + num_classes, 8:9]      # (C, 1)

    # Layer 1: Linear(5 -> 16) + ReLU  -> lane-dense (16, TB)
    h1 = jnp.dot(w1t, xt, preferred_element_type=jnp.float32) + b1t
    h1 = jnp.maximum(h1, 0.0)

    # Layer 2: Linear(16 -> 8) + ReLU  -> lane-dense (8, TB)
    h2 = jnp.dot(w2t, h1, preferred_element_type=jnp.float32) + b2t
    h2 = jnp.maximum(h2, 0.0)

    # Layer 3: Linear(8 -> C), logits  -> lane-dense (C, TB), unmasked stores
    out = jnp.dot(w3t, h2, preferred_element_type=jnp.float32) + b3t
    ot_ref[...] = out.astype(ot_ref.dtype)


def pack_params(params):
    """Pack all weights/biases into one (R, 128) f32 operand (layout above)."""
    C = params["w3"].shape[1]
    rows = _W3_ROW0 + max(8, ((C + 7) // 8) * 8)       # keep sublane-aligned
    p = jnp.zeros((rows, 128), jnp.float32)
    p = p.at[_W1_ROWS, 0:5].set(params["w1"].T)
    p = p.at[_W1_ROWS, 5].set(params["b1"])
    p = p.at[_W2_ROWS, 0:16].set(params["w2"].T)
    p = p.at[_W2_ROWS, 16].set(params["b2"])
    p = p.at[_W3_ROW0:_W3_ROW0 + C, 0:8].set(params["w3"].T)
    p = p.at[_W3_ROW0:_W3_ROW0 + C, 8].set(params["b3"])
    return p


def glcm_classifier_forward(x, params, *, block_batch=16384):
    """GLCMClassifier forward:  x (B, 5) f32  ->  logits (B, C) f32."""
    B = x.shape[0]
    C = params["w3"].shape[1]

    packed = pack_params(params)
    xt = x.T.astype(jnp.float32)                       # (5, B): batch on the lane axis

    if B <= block_batch:
        tb = B                                         # single tile (block == full dim)
    else:
        assert block_batch % 128 == 0, "multi-tile block_batch must be lane-aligned"
        tb = block_batch                               # multiple of 128; last tile ragged
    grid = (pl.cdiv(B, tb),)

    out_t = pl.pallas_call(
        functools.partial(_mlp_kernel, num_classes=C),
        out_shape=jax.ShapeDtypeStruct((C, B), jnp.float32),
        grid=grid,
        in_specs=[
            pl.BlockSpec((5, tb), lambda i: (0, i)),          # streamed batch tile
            pl.BlockSpec(packed.shape, lambda i: (0, 0)),     # VMEM-resident params
        ],
        out_specs=pl.BlockSpec((C, tb), lambda i: (0, i)),    # lane-dense logits tile
        compiler_params=pltpu.CompilerParams(
            dimension_semantics=("parallel",),                # megacore split on v7x
        ),
    )(xt, packed)

    return out_t.T                                      # back to PyTorch layout (B, C)


def init_params(key, num_classes):
    """Synthetic parameters matching nn.Linear shapes (weights stored (in, out))."""
    ks = jax.random.split(key, 6)
    dims = [(5, 16), (16, 8), (8, num_classes)]
    params = {}
    for i, (fan_in, fan_out) in enumerate(dims, start=1):
        bound = fan_in ** -0.5                          # PyTorch default uniform bound
        params[f"w{i}"] = jax.random.uniform(
            ks[2 * (i - 1)], (fan_in, fan_out), jnp.float32, -bound, bound)
        params[f"b{i}"] = jax.random.uniform(
            ks[2 * (i - 1) + 1], (fan_out,), jnp.float32, -bound, bound)
    return params


def reference_forward(x, params):
    h1 = jnp.maximum(x @ params["w1"] + params["b1"], 0.0)
    h2 = jnp.maximum(h1 @ params["w2"] + params["b2"], 0.0)
    return h2 @ params["w3"] + params["b3"]


if __name__ == "__main__":
    key = jax.random.PRNGKey(0)
    k_x, k_p, k_x2 = jax.random.split(key, 3)

    num_classes = 4
    params = init_params(k_p, num_classes)

    # Small batch of GLCM feature vectors (contrast, dissimilarity, homogeneity,
    # energy, correlation) -- single-tile path.
    x_small = jax.random.uniform(k_x, (8, 5), jnp.float32)
    logits = jax.block_until_ready(glcm_classifier_forward(x_small, params))
    ref = reference_forward(x_small, params)
    assert logits.shape == (8, num_classes)
    assert jnp.allclose(logits, ref, atol=1e-4, rtol=1e-4)

    # Multi-tile path: grid > 1 with a ragged last tile (forced small tile size).
    x_big = jax.random.uniform(k_x2, (300, 5), jnp.float32)
    logits_big = jax.block_until_ready(
        glcm_classifier_forward(x_big, params, block_batch=128))
    ref_big = reference_forward(x_big, params)
    assert logits_big.shape == (300, num_classes)
    assert jnp.allclose(logits_big, ref_big, atol=1e-4, rtol=1e-4)

    print("KERNEL_OK")
</pallas_src>

<mosaic_0001>
module attributes {stable_mosaic.version = 11 : i64} {
  func.func @_mlp_kernel(%arg0: i32, %arg1: memref<5x8xf32, #tpu.memory_space<vmem>>, %arg2: memref<32x128xf32, #tpu.memory_space<vmem>>, %arg3: memref<4x8xf32, #tpu.memory_space<vmem>>) attributes {dimension_semantics = [#tpu.dimension_semantics<parallel>], iteration_bounds = array<i64: 1>, scalar_prefetch = 0 : i64, scratch_operands = 0 : i64, tpu.core_type = #tpu.core_type<tc>, window_params = [{transform_indices = @transform_0, window_bounds = array<i64: 5, 8>}, {pipeline_mode = #tpu.pipeline_mode<synchronous>, transform_indices = @transform_1, window_bounds = array<i64: 32, 128>}, {transform_indices = @transform_2, window_bounds = array<i64: 4, 8>}]} {
    %c0 = arith.constant 0 : index
    %c0_0 = arith.constant 0 : index
    %0 = vector.load %arg1[%c0, %c0_0] : memref<5x8xf32, #tpu.memory_space<vmem>>, vector<5x8xf32>
    %c0_1 = arith.constant 0 : index
    %c0_2 = arith.constant 0 : index
    %1 = vector.load %arg2[%c0_1, %c0_2] : memref<32x128xf32, #tpu.memory_space<vmem>>, vector<32x128xf32>
    %2 = vector.extract_strided_slice %1 {offsets = [0, 0], sizes = [16, 5], strides = [1, 1]} : vector<32x128xf32> to vector<16x5xf32>
    %3 = vector.extract_strided_slice %1 {offsets = [0, 5], sizes = [16, 1], strides = [1, 1]} : vector<32x128xf32> to vector<16x1xf32>
    %4 = vector.extract_strided_slice %1 {offsets = [16, 0], sizes = [8, 16], strides = [1, 1]} : vector<32x128xf32> to vector<8x16xf32>
    %5 = vector.extract_strided_slice %1 {offsets = [16, 16], sizes = [8, 1], strides = [1, 1]} : vector<32x128xf32> to vector<8x1xf32>
    %6 = vector.extract_strided_slice %1 {offsets = [24, 0], sizes = [4, 8], strides = [1, 1]} : vector<32x128xf32> to vector<4x8xf32>
    %7 = vector.extract_strided_slice %1 {offsets = [24, 8], sizes = [4, 1], strides = [1, 1]} : vector<32x128xf32> to vector<4x1xf32>
    %cst = arith.constant dense<0.000000e+00> : vector<16x8xf32>
    %8 = tpu.matmul %2, %0, %cst {dimension_numbers = #tpu.dot_dimension_numbers<[1], [0], [0], [1], [0, 0, 1, 1], [], []>} : vector<16x5xf32>, vector<5x8xf32>, vector<16x8xf32> -> vector<16x8xf32>
    %9 = vector.broadcast %3 : vector<16x1xf32> to vector<16x8xf32>
    %10 = arith.addf %8, %9 : vector<16x8xf32>
    %cst_3 = arith.constant 0.000000e+00 : f32
    %11 = vector.broadcast %cst_3 : f32 to vector<16x8xf32>
    %12 = arith.maximumf %10, %11 : vector<16x8xf32>
    %cst_4 = arith.constant dense<0.000000e+00> : vector<8x8xf32>
    %13 = tpu.matmul %4, %12, %cst_4 {dimension_numbers = #tpu.dot_dimension_numbers<[1], [0], [0], [1], [0, 0, 1, 1], [], []>} : vector<8x16xf32>, vector<16x8xf32>, vector<8x8xf32> -> vector<8x8xf32>
    %14 = vector.broadcast %5 : vector<8x1xf32> to vector<8x8xf32>
    %15 = arith.addf %13, %14 : vector<8x8xf32>
    %cst_5 = arith.constant 0.000000e+00 : f32
    %16 = vector.broadcast %cst_5 : f32 to vector<8x8xf32>
    %17 = arith.maximumf %15, %16 : vector<8x8xf32>
    %cst_6 = arith.constant dense<0.000000e+00> : vector<4x8xf32>
    %18 = tpu.matmul %6, %17, %cst_6 {dimension_numbers = #tpu.dot_dimension_numbers<[1], [0], [0], [1], [0, 0, 1, 1], [], []>} : vector<4x8xf32>, vector<8x8xf32>, vector<4x8xf32> -> vector<4x8xf32>
    %19 = vector.broadcast %7 : vector<4x1xf32> to vector<4x8xf32>
    %20 = arith.addf %18, %19 : vector<4x8xf32>
    %c0_7 = arith.constant 0 : index
    %c0_8 = arith.constant 0 : index
    %21 = vector.load %arg3[%c0_7, %c0_8] : memref<4x8xf32, #tpu.memory_space<vmem>>, vector<4x8xf32>
    tpu.vector_store %arg3[%c0_7, %c0_8], %20 {strides = array<i32>} : memref<4x8xf32, #tpu.memory_space<vmem>>, vector<4x8xf32>,
    return
  }
  func.func @transform_0(%arg0: i32) -> (i32, i32) {
    %c0_i32 = arith.constant 0 : i32
    %c0_i32_0 = arith.constant 0 : i32
    return %c0_i32, %arg0 : i32, i32
  }
  func.func @transform_1(%arg0: i32) -> (i32, i32) {
    %c0_i32 = arith.constant 0 : i32
    %c0_i32_0 = arith.constant 0 : i32
    %c0_i32_1 = arith.constant 0 : i32
    return %c0_i32, %c0_i32_0 : i32, i32
  }
  func.func @transform_2(%arg0: i32) -> (i32, i32) {
    %c0_i32 = arith.constant 0 : i32
    %c0_i32_0 = arith.constant 0 : i32
    return %c0_i32, %arg0 : i32, i32
  }
}

</mosaic_0001>

<bundles_post_ra>
// kernel: tpu_custom_call.1
= control target key start
LH: loop header
LB: loop body
LE: loop exit
PB: predicated region body
PF: predicated region fallthrough
CT: control target
= control target key end

     0   :  { %7 = vsyncpa [#allocation3], 0  ;;  %s503_s0 = inlined_call_operand.hbm [shape: f32[5,8], index: 0, kind: input, shape index: {}]   ;;  %s504_s1 = inlined_call_operand.hbm [shape: f32[32,128], index: 1, kind: input, shape index: {}]   ;;  %s505_s2 = inlined_call_operand.hbm [shape: f32[4,8], index: 2, kind: output, shape index: {}]  }
   0x1   :  { %8 = vsyncpa [#allocation6], 0 }
   0x2   :  { %9 = vsyncpa [#allocation4], 0  ;;  %s434_s9 = smov [#allocation2]   ;;  %s435_s11 = smov [#allocation5]  }
   0x3   :  { %s16_s10 = sshll.u32 %s434_s9, 4  ;;  %s25_s12 = sshll.u32 %s435_s11, 4  ;;  %s17_s10 = int_to_ptr.vmem [resolvable:$true] %s16_s10  ;;  %s460_s12 = int_to_ptr.vmem [resolvable:$true] %s25_s12 }
   0x4   :  { %s362_s15 = scalar_lea.hbm %s503_s0, 128 }
   0x5   :  { %p363_p0 = scmp.ne.s32.totalorder %s503_s0, %s362_s15  ;;  %p366_p1 = scmp.lt.u32.totalorder %s362_s15, %s503_s0 }
   0x7   :  { %p368_p2 = pnand %p366_p1, %p363_p0 }
   0x9   :  { %371 = shalt.err (!%p368_p2)
}
   0xa   :  { %s372_s20 = scalar_lea.vmem %s17_s10, 128  ;;  %p377_p4 = scmp.lt.s32.totalorder %s17_s10, %s17_s10 }
   0xb   :  { %p373_p3 = scmp.ne.s32.totalorder %s17_s10, %s372_s20  ;;  %p378_p5 = scmp.lt.s32.totalorder %s372_s20, %s372_s20 }
   0xd   :  { %p379_p6 = por %p378_p5, %p377_p4 }
   0xf   :  { %p380_p7 = pnand %p379_p6, %p373_p3 }
  0x11   :  { %383 = shalt.err (!%p380_p7)
}
  0x12   :  { %19 = dma.hbm_to_vmem [thread:$0]  %s503_s0, 128, %s17_s10, [#allocation3]  }
  0x13   :  { %s384_s25 = scalar_lea.hbm %s504_s1, 512 }
  0x14   :  { %p385_p8 = scmp.ne.s32.totalorder %s504_s1, %s384_s25  ;;  %p388_p9 = scmp.lt.u32.totalorder %s384_s25, %s504_s1 }
  0x16   :  { %p390_p10 = pnand %p388_p9, %p385_p8 }
  0x18   :  { %393 = shalt.err (!%p390_p10)
}
  0x19   :  { %s394_s30 = scalar_lea.vmem %s460_s12, 512  ;;  %p399_p12 = scmp.lt.s32.totalorder %s460_s12, %s460_s12 }
  0x1a   :  { %p395_p11 = scmp.ne.s32.totalorder %s460_s12, %s394_s30  ;;  %p400_p13 = scmp.lt.s32.totalorder %s394_s30, %s394_s30 }
  0x1c   :  { %p401_p0 = por %p400_p13, %p399_p12 }
  0x1e   :  { %p402_p1 = pnand %p401_p0, %p395_p11 }
  0x20   :  { %405 = shalt.err (!%p402_p1)
}
  0x21   :  { %s436_s0 = smov 128   ;;  %s437_s3 = smov 8  }
  0x22   :  { %31 = dma.hbm_to_vmem [thread:$0]  %s504_s1, 512, %s460_s12, [#allocation6], %s436_s0, %s436_s0, %s437_s3  }
  0x23   :  { %428 = dma.done.wait [#allocation3], 128  }
  0x24   :  { %429 = vsyncadd [#allocation3], 4294967168 }
  0x25   :  { %430 = dma.done.wait [#allocation6], 512  }
  0x26   :  { %431 = vsyncadd [#allocation6], 4294966784  ;;  %v438_v0 = vmov 5   ;;  %vm58_vm0 = vcmask 1044480   ;;  %vm53_vm1 = vcmask 39936   ;;  %v39_v2 = vld [vmem:[#allocation5] sm:$0xff] }
  0x27   :  { %358 = vset.pattern.permute.xlu0 %v438_v0  ;;  %v38_v1 = vld [vmem:[#allocation2] sm:$0x1f]  ;;  %v40_v3 = vld [vmem:[#allocation5 + $0x8] sm:$0xff]  ;;  %329 = vmatprep.mubr.msk.f32.mxu0 %vm53_vm1, %v39_v2  ;;  %v439_v4 = vmov 0.0|0.0   ;;  %vm440_vm2 = vmmov 0   ;;  %v441_v5 = vmov 0.0  }
  0x28   :  { %327 = vmatprep.subr.msk.mxu0 %vm58_vm0, %v38_v1  ;;  %45 = vperm.xlu0 %358, %v39_v2   ;;  %v41_v6 = vld [vmem:[#allocation5 + $0x10] sm:$0xff]  ;;  %v442_v7 = vmov 16   ;;  %vm144_vm3 = vcmask 130048   ;;  %v42_v17 = vld [vmem:[#allocation5 + $0x18] sm:$0xff]  ;;  %v443_v18 = vmov 8   ;;  %vm223_vm4 = vcmask 64512  }
  0x29   :  { %328 = vmatpush3.msk.msra.mxu0 %vm58_vm0, %v38_v1  ;;  %344 = vmatprep.subr.bf16.mxu1 %v439_v4  ;;  %s444_s1 = smov [#allocation7]   ;;  %vm296_vm5 = vcmask 60416  }
  0x2a   :  { %330 = vmatmul.mubr.msk.f32.vlgmr.msra.gmra.mrb[0].mxu0 %vm53_vm1, %v40_v3  ;;  %336 = vmatprep.mubr.msk.f32.mxu1 %vm440_vm2, %v441_v5  ;;  %s304_s6 = sshll.u32 %s444_s1, 4  ;;  %s305_s6 = int_to_ptr.vmem [resolvable:$true] %s304_s6 }
  0x2b   :  { %339 = vmatprep.subr.mxu0 %v441_v5  ;;  %341 = vmatprep.mubr.msk.f32.mxu0 %vm440_vm2, %v441_v5  ;;  %s406_s7 = scalar_lea.vmem %s305_s6, 64  ;;  %p411_p3 = scmp.lt.s32.totalorder %s305_s6, %s305_s6 }
  0x2c   :  { %50 = vperm.xlu0 %358, %v40_v3   ;;  %359 = vset.pattern.permute.xlu1 %v442_v7  ;;  %p407_p2 = scmp.ne.s32.totalorder %s305_s6, %s406_s7  ;;  %p412_p4 = scmp.lt.s32.totalorder %s406_s7, %s406_s7 }
  0x2d   :  { %141 = vperm.xlu1 %359, %v41_v6  }
  0x2e   :  { %p413_p5 = por %p412_p4, %p411_p3 }
  0x30   :  { %361 = vset.pattern.permute.xlu0 %v443_v18  ;;  %p414_p6 = pnand %p413_p5, %p407_p2 }
  0x31   :  { %360 = vset.pattern.permute.xlu1 %v443_v18 }
  0x32   :  { %220 = vperm.xlu1 %360, %v42_v17  }
  0xa7   :  { %v46_v8 = vpop.permute.xlu0 %45 }
  0xab   :  { %v51_v9 = vpop.permute.xlu0 %50 }
  0xac   :  { %v142_v19 = vpop.permute.xlu1 %141 }
  0xb1   :  { %v221_v24 = vpop.permute.xlu1 %220 }
  0xfd   :  { %v331_v10 = vpop.f32.mrb[0].mxu0 }
  0xfe   :  { %v134_v11 = vadd.f32 %v331_v10, %v51_v9  ;;  %v128_v12 = vpop.f32.mrb[1].mxu0 }
  0xff   :  { %v129_v13 = vadd.f32 %v128_v12, %v46_v8 }
 0x100   :  { %v138_v14 = vmax.f32 %v134_v11, 0.0 }
 0x101   :  { %v137_v15 = vmax.f32 %v129_v13, 0.0 }
 0x103   :  { %v345_v16 = vpack.c.bf16 %v138_v14, %v137_v15 }
 0x105   :  { %346 = vmatpush3.bf16.msra.mxu1 %v345_v16 }
 0x108   :  { %337 = vmatmul.mubr.msk.f32.vlgmr.msra.gmra.mrb[0].mxu1 %vm144_vm3, %v41_v6 }
 0x1db   :  { %v213_v20 = vpop.f32.mrb[0].mxu1 }
 0x1dc   :  { %v214_v21 = vadd.f32 %v213_v20, %v142_v19  ;;  %v338_v22 = vpop.f32.mrb[1].mxu1 }
 0x1de   :  { %v217_v23 = vmax.f32 %v214_v21, 0.0 }
 0x1e0   :  { %340 = vmatpush3.msra.mxu0 %v217_v23 }
 0x1e1   :  { %342 = vmatmul.mubr.msk.f32.vlgmr.msra.gmra.mrb[2].mxu0 %vm223_vm4, %v42_v17 }
 0x2b4   :  { %v292_v25 = vpop.f32.mrb[2].mxu0 }
 0x2b5   :  { %v293_v26 = vadd.f32 %v292_v25, %v221_v24  ;;  %v343_v27 = vpop.f32.mrb[3].mxu0 }
 0x2b7   :  { %297 = vst.msk [vmem:[#allocation7] sm:$0xf] %vm296_vm5, %v293_v26 }
 0x2b8   :  { %417 = shalt.err (!%p414_p6)
}
 0x2b9   :  { %s418_s10 = scalar_lea.hbm %s505_s2, 64 }
 0x2ba   :  { %p419_p7 = scmp.ne.s32.totalorder %s505_s2, %s418_s10  ;;  %p422_p8 = scmp.lt.u32.totalorder %s418_s10, %s505_s2 }
 0x2bc   :  { %p424_p9 = pnand %p422_p8, %p419_p7 }
 0x2be   :  { %427 = shalt.err (!%p424_p9)
}
 0x2bf   :  { %307 = dma.vmem_to_hbm [thread:$0]  %s305_s6, 64, %s505_s2, [#allocation4]  }
 0x2c0   :  { %432 = dma.done.wait [#allocation4], 64  }
 0x2c1   :  { %433 = vsyncadd [#allocation4], 4294967232 }
 0x2c2   :  { %311 = vsyncpa [#allocation3], 1 }
 0x2c3   :  { %312 = vsyncpa [#allocation6], 1 }
 0x2c4   :  { %313 = vsyncpa [#allocation4], 1 }

</bundles_post_ra>
